<compile_context>
chip_gen: v7x
topology: tpu7x:2x2x1
jax: 0.10.0
libtpu: 0.0.40
codegen_flags: <defaults>
</compile_context>

<pallas_src>
import functools

import jax
import jax.numpy as jnp
from jax.experimental import pallas as pl
from jax.experimental.pallas import tpu as pltpu


def _round_up(x, m):
    return ((x + m - 1) // m) * m


# ---------------------------------------------------------------------------
# Kernel: fused 3-layer MLP on one batch tile.  Weights/biases are resident
# (constant index_map -> DMA'd once), only x / out stream per grid step.
# ---------------------------------------------------------------------------
def mlp_kernel(x_ref, w1_ref, b1_ref, w2_ref, b2_ref, w3_ref, b3_ref, o_ref):
    mm_dtype = w1_ref.dtype  # bf16 when requested (v5e/v6e/v7x), else f32
    x = x_ref[...].astype(mm_dtype)
    h1 = jnp.dot(x, w1_ref[...], preferred_element_type=jnp.float32) + b1_ref[...]
    h1 = jnp.maximum(h1, 0.0)
    h2 = jnp.dot(h1.astype(mm_dtype), w2_ref[...],
                 preferred_element_type=jnp.float32) + b2_ref[...]
    h2 = jnp.maximum(h2, 0.0)
    out = jnp.dot(h2.astype(mm_dtype), w3_ref[...],
                  preferred_element_type=jnp.float32) + b3_ref[...]
    o_ref[...] = out.astype(o_ref.dtype)


# ---------------------------------------------------------------------------
# One-time parameter prep (hoisted out of the per-forward path).
# ---------------------------------------------------------------------------
def prepare_params(w1, b1, w2, b2, w3, b3, matmul_dtype=None):
    """Reshape biases to (1, out) f32; optionally pre-cast weights to bf16."""
    def prep_w(w):
        return w.astype(matmul_dtype) if matmul_dtype is not None else w

    def prep_b(b):
        return b.reshape(1, -1).astype(jnp.float32)

    return (prep_w(w1), prep_b(b1), prep_w(w2), prep_b(b2), prep_w(w3), prep_b(b3))


# ---------------------------------------------------------------------------
# Generation-aware tile selection (static, outside jit).
# ---------------------------------------------------------------------------
def _num_tensorcores():
    try:
        kind = jax.devices()[0].device_kind.lower()
    except Exception:  # pragma: no cover - defensive
        return 1
    return 2 if "v7" in kind else 1  # v5e / v6e: 1 TC per chip; v7x: 2 TCs


def _choose_batch_tile(batch, num_cores):
    b8 = _round_up(max(batch, 1), 8)
    if num_cores <= 1:
        # Single TensorCore: one big tile amortizes per-step overhead best.
        return min(b8, 1024)
    # 2 TensorCores: >= num_cores grid steps, rounded to a multiple of
    # num_cores so both cores get equal work.
    target_tiles = max(num_cores, _round_up(-(-b8 // 512), num_cores))
    return max(8, _round_up(-(-b8 // target_tiles), 8))


# ---------------------------------------------------------------------------
# Forward pass.
# ---------------------------------------------------------------------------
@functools.partial(jax.jit, static_argnames=("batch_tile",))
def _forward_impl(x, w1, b1, w2, b2, w3, b3, *, batch_tile):
    B, in_dim = x.shape
    hid = w1.shape[1]
    ncls = w3.shape[1]
    out_dtype = x.dtype

    B_pad = _round_up(B, batch_tile)
    if B_pad != B:
        x = jnp.pad(x, ((0, B_pad - B), (0, 0)))  # only batch rows are padded

    grid = (B_pad // batch_tile,)

    # Advisory cost estimate (true, unpadded math).
    flops = 2 * B_pad * (in_dim * hid + hid * hid + hid * ncls)
    bytes_accessed = sum(int(a.size) * jnp.dtype(a.dtype).itemsize
                         for a in (x, w1, b1, w2, b2, w3, b3))
    bytes_accessed += B_pad * ncls * jnp.dtype(out_dtype).itemsize

    # VMEM budget: double-buffered x/out tiles + (double-buffered) resident
    # weights/biases + f32 intermediates.  Explicit limit with headroom keeps
    # us honest on v7x's 64 MiB (32 MiB default scoped) VMEM.
    itemsize = lambda a: jnp.dtype(a.dtype).itemsize
    x_tile_bytes = batch_tile * in_dim * itemsize(x)
    out_tile_bytes = batch_tile * ncls * jnp.dtype(out_dtype).itemsize
    wb_bytes = sum(int(a.size) * itemsize(a) for a in (w1, b1, w2, b2, w3, b3))
    h_bytes = 2 * batch_tile * hid * 4
    vmem_need = 2 * (x_tile_bytes + out_tile_bytes) + 2 * wb_bytes + h_bytes
    vmem_limit = int(min(max(4 * vmem_need, 8 << 20), 64 << 20))

    out = pl.pallas_call(
        mlp_kernel,
        out_shape=jax.ShapeDtypeStruct((B_pad, ncls), out_dtype),
        grid_spec=pltpu.PrefetchScalarGridSpec(
            num_scalar_prefetch=0,
            grid=grid,
            in_specs=[
                # x: tiled over the batch (M) axis; true (unpadded) K.
                pl.BlockSpec((batch_tile, in_dim), lambda i: (i, 0)),
                # Weights / biases: full-array blocks (legal even when not
                # 128-multiples), constant index_map -> resident across grid.
                pl.BlockSpec((in_dim, hid), lambda i: (0, 0)),
                pl.BlockSpec((1, hid), lambda i: (0, 0)),
                pl.BlockSpec((hid, hid), lambda i: (0, 0)),
                pl.BlockSpec((1, hid), lambda i: (0, 0)),
                pl.BlockSpec((hid, ncls), lambda i: (0, 0)),
                pl.BlockSpec((1, ncls), lambda i: (0, 0)),
            ],
            # Output at its true width -> minimal HBM writeback, no post-slice.
            out_specs=pl.BlockSpec((batch_tile, ncls), lambda i: (i, 0)),
        ),
        compiler_params=pltpu.CompilerParams(
            dimension_semantics=("parallel",),
            vmem_limit_bytes=vmem_limit,
        ),
        cost_estimate=pl.CostEstimate(
            flops=flops, transcendentals=0, bytes_accessed=bytes_accessed),
    )(x, w1, b1, w2, b2, w3, b3)

    if B_pad != B:
        out = out[:B]
    return out


def neural_net_forward(x, params, *, batch_tile=None, num_cores=None):
    """params = prepare_params(...); x: [B, input_size] -> [B, num_classes]."""
    if num_cores is None:
        num_cores = _num_tensorcores()
    if batch_tile is None:
        batch_tile = _choose_batch_tile(x.shape[0], num_cores)
    return _forward_impl(x, *params, batch_tile=batch_tile)


# ---------------------------------------------------------------------------
# Initialization matching torch.nn.Linear's U(-1/sqrt(fan_in), 1/sqrt(fan_in)).
# ---------------------------------------------------------------------------
def init_linear_params(key, in_features, out_features, dtype=jnp.float32):
    k_w, k_b = jax.random.split(key)
    bound = 1.0 / (in_features ** 0.5)
    # Stored as [in, out] so the kernel computes x @ W (== x @ W_torch.T).
    w = jax.random.uniform(k_w, (in_features, out_features), dtype,
                           minval=-bound, maxval=bound)
    b = jax.random.uniform(k_b, (out_features,), dtype,
                           minval=-bound, maxval=bound)
    return w, b


if __name__ == "__main__":
    # Small shapes consistent with the module's forward: x is [batch, input_size].
    batch = 128
    input_size = 32
    hidden_size = 64
    num_classes = 16

    key = jax.random.PRNGKey(0)
    kx, k1, k2, k3 = jax.random.split(key, 4)

    x = jax.random.normal(kx, (batch, input_size), jnp.float32)
    w1, b1 = init_linear_params(k1, input_size, hidden_size)
    w2, b2 = init_linear_params(k2, hidden_size, hidden_size)
    w3, b3 = init_linear_params(k3, hidden_size, num_classes)

    # Pure-JAX reference (same math as the PyTorch forward).
    ref = jnp.maximum(x @ w1 + b1[None, :], 0.0)
    ref = jnp.maximum(ref @ w2 + b2[None, :], 0.0)
    ref = ref @ w3 + b3[None, :]

    # f32 path.
    params_f32 = prepare_params(w1, b1, w2, b2, w3, b3)
    out = neural_net_forward(x, params_f32)
    out = jax.block_until_ready(out)
    assert out.shape == (batch, num_classes)
    assert jnp.allclose(out, ref, atol=1e-4, rtol=1e-4)

    # bf16-operand path (weights pre-cast once; f32 accumulation + f32
    # bias/ReLU keep accuracy close to the f32 reference).
    params_bf16 = prepare_params(w1, b1, w2, b2, w3, b3,
                                 matmul_dtype=jnp.bfloat16)
    out_bf16 = neural_net_forward(x, params_bf16)
    out_bf16 = jax.block_until_ready(out_bf16)
    assert out_bf16.shape == (batch, num_classes)
    assert jnp.allclose(out_bf16, ref, atol=5e-2, rtol=5e-2)

    print("KERNEL_OK")
</pallas_src>

<mosaic_0001>
module attributes {stable_mosaic.version = 11 : i64} {
  func.func @mlp_kernel(%arg0: i32, %arg1: memref<128x32xf32, #tpu.memory_space<vmem>>, %arg2: memref<32x64xf32, #tpu.memory_space<vmem>>, %arg3: memref<1x64xf32, #tpu.memory_space<vmem>>, %arg4: memref<64x64xf32, #tpu.memory_space<vmem>>, %arg5: memref<1x64xf32, #tpu.memory_space<vmem>>, %arg6: memref<64x16xf32, #tpu.memory_space<vmem>>, %arg7: memref<1x16xf32, #tpu.memory_space<vmem>>, %arg8: memref<128x16xf32, #tpu.memory_space<vmem>>) attributes {dimension_semantics = [#tpu.dimension_semantics<parallel>], iteration_bounds = array<i64: 1>, scalar_prefetch = 0 : i64, scratch_operands = 0 : i64, tpu.core_type = #tpu.core_type<tc>, window_params = [{transform_indices = @transform_0, window_bounds = array<i64: 128, 32>}, {pipeline_mode = #tpu.pipeline_mode<synchronous>, transform_indices = @transform_1, window_bounds = array<i64: 32, 64>}, {pipeline_mode = #tpu.pipeline_mode<synchronous>, transform_indices = @transform_2, window_bounds = array<i64: 1, 64>}, {pipeline_mode = #tpu.pipeline_mode<synchronous>, transform_indices = @transform_3, window_bounds = array<i64: 64, 64>}, {pipeline_mode = #tpu.pipeline_mode<synchronous>, transform_indices = @transform_4, window_bounds = array<i64: 1, 64>}, {pipeline_mode = #tpu.pipeline_mode<synchronous>, transform_indices = @transform_5, window_bounds = array<i64: 64, 16>}, {pipeline_mode = #tpu.pipeline_mode<synchronous>, transform_indices = @transform_6, window_bounds = array<i64: 1, 16>}, {transform_indices = @transform_7, window_bounds = array<i64: 128, 16>}]} {
    %c0 = arith.constant 0 : index
    %c0_0 = arith.constant 0 : index
    %0 = vector.load %arg1[%c0, %c0_0] : memref<128x32xf32, #tpu.memory_space<vmem>>, vector<128x32xf32>
    %c0_1 = arith.constant 0 : index
    %c0_2 = arith.constant 0 : index
    %1 = vector.load %arg2[%c0_1, %c0_2] : memref<32x64xf32, #tpu.memory_space<vmem>>, vector<32x64xf32>
    %cst = arith.constant dense<0.000000e+00> : vector<128x64xf32>
    %2 = tpu.matmul %0, %1, %cst {dimension_numbers = #tpu.dot_dimension_numbers<[1], [0], [0], [1], [0, 0, 1, 1], [], []>} : vector<128x32xf32>, vector<32x64xf32>, vector<128x64xf32> -> vector<128x64xf32>
    %c0_3 = arith.constant 0 : index
    %c0_4 = arith.constant 0 : index
    %3 = vector.load %arg3[%c0_3, %c0_4] : memref<1x64xf32, #tpu.memory_space<vmem>>, vector<1x64xf32>
    %4 = vector.broadcast %3 : vector<1x64xf32> to vector<128x64xf32>
    %5 = arith.addf %2, %4 : vector<128x64xf32>
    %cst_5 = arith.constant 0.000000e+00 : f32
    %6 = vector.broadcast %cst_5 : f32 to vector<128x64xf32>
    %7 = arith.maximumf %5, %6 : vector<128x64xf32>
    %c0_6 = arith.constant 0 : index
    %c0_7 = arith.constant 0 : index
    %8 = vector.load %arg4[%c0_6, %c0_7] : memref<64x64xf32, #tpu.memory_space<vmem>>, vector<64x64xf32>
    %cst_8 = arith.constant dense<0.000000e+00> : vector<128x64xf32>
    %9 = tpu.matmul %7, %8, %cst_8 {dimension_numbers = #tpu.dot_dimension_numbers<[1], [0], [0], [1], [0, 0, 1, 1], [], []>} : vector<128x64xf32>, vector<64x64xf32>, vector<128x64xf32> -> vector<128x64xf32>
    %c0_9 = arith.constant 0 : index
    %c0_10 = arith.constant 0 : index
    %10 = vector.load %arg5[%c0_9, %c0_10] : memref<1x64xf32, #tpu.memory_space<vmem>>, vector<1x64xf32>
    %11 = vector.broadcast %10 : vector<1x64xf32> to vector<128x64xf32>
    %12 = arith.addf %9, %11 : vector<128x64xf32>
    %cst_11 = arith.constant 0.000000e+00 : f32
    %13 = vector.broadcast %cst_11 : f32 to vector<128x64xf32>
    %14 = arith.maximumf %12, %13 : vector<128x64xf32>
    %c0_12 = arith.constant 0 : index
    %c0_13 = arith.constant 0 : index
    %15 = vector.load %arg6[%c0_12, %c0_13] : memref<64x16xf32, #tpu.memory_space<vmem>>, vector<64x16xf32>
    %cst_14 = arith.constant dense<0.000000e+00> : vector<128x16xf32>
    %16 = tpu.matmul %14, %15, %cst_14 {dimension_numbers = #tpu.dot_dimension_numbers<[1], [0], [0], [1], [0, 0, 1, 1], [], []>} : vector<128x64xf32>, vector<64x16xf32>, vector<128x16xf32> -> vector<128x16xf32>
    %c0_15 = arith.constant 0 : index
    %c0_16 = arith.constant 0 : index
    %17 = vector.load %arg7[%c0_15, %c0_16] : memref<1x16xf32, #tpu.memory_space<vmem>>, vector<1x16xf32>
    %18 = vector.broadcast %17 : vector<1x16xf32> to vector<128x16xf32>
    %19 = arith.addf %16, %18 : vector<128x16xf32>
    %c0_17 = arith.constant 0 : index
    %c0_18 = arith.constant 0 : index
    %20 = vector.load %arg8[%c0_17, %c0_18] : memref<128x16xf32, #tpu.memory_space<vmem>>, vector<128x16xf32>
    tpu.vector_store %arg8[%c0_17, %c0_18], %19 {strides = array<i32>} : memref<128x16xf32, #tpu.memory_space<vmem>>, vector<128x16xf32>,
    return
  }
  func.func @transform_0(%arg0: i32) -> (i32, i32) {
    %c0_i32 = arith.constant 0 : i32
    %c0_i32_0 = arith.constant 0 : i32
    return %arg0, %c0_i32 : i32, i32
  }
  func.func @transform_1(%arg0: i32) -> (i32, i32) {
    %c0_i32 = arith.constant 0 : i32
    %c0_i32_0 = arith.constant 0 : i32
    %c0_i32_1 = arith.constant 0 : i32
    return %c0_i32, %c0_i32_0 : i32, i32
  }
  func.func @transform_2(%arg0: i32) -> (i32, i32) {
    %c0_i32 = arith.constant 0 : i32
    %c0_i32_0 = arith.constant 0 : i32
    %c0_i32_1 = arith.constant 0 : i32
    return %c0_i32, %c0_i32_0 : i32, i32
  }
  func.func @transform_3(%arg0: i32) -> (i32, i32) {
    %c0_i32 = arith.constant 0 : i32
    %c0_i32_0 = arith.constant 0 : i32
    %c0_i32_1 = arith.constant 0 : i32
    return %c0_i32, %c0_i32_0 : i32, i32
  }
  func.func @transform_4(%arg0: i32) -> (i32, i32) {
    %c0_i32 = arith.constant 0 : i32
    %c0_i32_0 = arith.constant 0 : i32
    %c0_i32_1 = arith.constant 0 : i32
    return %c0_i32, %c0_i32_0 : i32, i32
  }
  func.func @transform_5(%arg0: i32) -> (i32, i32) {
    %c0_i32 = arith.constant 0 : i32
    %c0_i32_0 = arith.constant 0 : i32
    %c0_i32_1 = arith.constant 0 : i32
    return %c0_i32, %c0_i32_0 : i32, i32
  }
  func.func @transform_6(%arg0: i32) -> (i32, i32) {
    %c0_i32 = arith.constant 0 : i32
    %c0_i32_0 = arith.constant 0 : i32
    %c0_i32_1 = arith.constant 0 : i32
    return %c0_i32, %c0_i32_0 : i32, i32
  }
  func.func @transform_7(%arg0: i32) -> (i32, i32) {
    %c0_i32 = arith.constant 0 : i32
    %c0_i32_0 = arith.constant 0 : i32
    return %arg0, %c0_i32 : i32, i32
  }
}

</mosaic_0001>

<bundles_post_ra>
// kernel: _forward_impl.1
= control target key start
LH: loop header
LB: loop body
LE: loop exit
PB: predicated region body
PF: predicated region fallthrough
CT: control target
= control target key end

     0   :  { %vm53_vm0 = vcmask 261120   ;;  %vm278_vm1 = vcmask 523264   ;;  %vm696_vm2 = vcmask 130048   ;;  %s1261_s1 = inlined_call_operand.vmem [shape: f32[32,64], index: 1, kind: input, shape index: {}]   ;;  %s1262_s0 = inlined_call_operand.vmem [shape: f32[128,32], index: 0, kind: input, shape index: {}]   ;;  %s1263_s3 = inlined_call_operand.vmem [shape: f32[64,64], index: 3, kind: input, shape index: {}]   ;;  %s1264_s5 = inlined_call_operand.vmem [shape: f32[64,16], index: 5, kind: input, shape index: {}]   ;;  %s1265_s2 = inlined_call_operand.vmem [shape: f32[1,64], index: 2, kind: input, shape index: {}]   ;;  %s1266_s4 = inlined_call_operand.vmem [shape: f32[1,64], index: 4, kind: input, shape index: {}]   ;;  %s1267_s6 = inlined_call_operand.vmem [shape: f32[1,16], index: 6, kind: input, shape index: {}]   ;;  %s1268_s7 = inlined_call_operand.vmem [shape: f32[128,16], index: 7, kind: output, shape index: {}]  }
   0x1   :  { %v42_v0 = vld [vmem:[%s1261_s1] sm:$0xff]  ;;  %v43_v1 = vld [vmem:[%s1261_s1 + $0x8] sm:$0xff]  ;;  %v44_v2 = vld [vmem:[%s1261_s1 + $0x10] sm:$0xff] }
   0x2   :  { %v948_v3 = vpack.c.bf16 %v43_v1, %v42_v0  ;;  %v45_v4 = vld [vmem:[%s1261_s1 + $0x18] sm:$0xff]  ;;  %v26_v5 = vld [vmem:[%s1262_s0] sm:$0xff]  ;;  %v264_v9 = vld [vmem:[%s1263_s3 + $0x8] sm:$0xff] }
   0x3   :  { %v952_v6 = vpack.c.bf16 %v45_v4, %v44_v2  ;;  %844 = vmatprep.mubr.msk.f32.mxu0 %vm53_vm0, %v26_v5  ;;  %v34_v7 = vld [vmem:[%s1262_s0 + $0x40] sm:$0xff]  ;;  %v265_v10 = vld [vmem:[%s1263_s3 + $0x10] sm:$0xff]  ;;  %v266_v11 = vld [vmem:[%s1263_s3 + $0x18] sm:$0xff] }
   0x4   :  { %949 = vmatprep.subr.bf16.mxu0 %v948_v3  ;;  %988 = vmatprep.subr.bf16.mxu1 %v948_v3  ;;  %v263_v8 = vld [vmem:[%s1263_s3] sm:$0xff]  ;;  %v27_v12 = vld [vmem:[%s1262_s0 + $0x8] sm:$0xff]  ;;  %v28_v15 = vld [vmem:[%s1262_s0 + $0x10] sm:$0xff]  ;;  %v960_v17 = vpack.c.bf16 %v266_v11, %v265_v10 }
   0x5   :  { %951 = vmatpush3.bf16.msra.mxu0 %v948_v3  ;;  %990 = vmatpush3.bf16.msra.mxu1 %v948_v3  ;;  %v35_v13 = vld [vmem:[%s1262_s0 + $0x48] sm:$0xff]  ;;  %v956_v14 = vpack.c.bf16 %v264_v9, %v263_v8  ;;  %v36_v16 = vld [vmem:[%s1262_s0 + $0x50] sm:$0xff]  ;;  %v267_v18 = vld [vmem:[%s1263_s3 + $0x20] sm:$0xff] }
   0x6   :  { %953 = vmatprep.subr.bf16.mxu0 %v952_v6  ;;  %989 = vmatprep.subr.bf16.mxu1 %v952_v6  ;;  %v268_v19 = vld [vmem:[%s1263_s3 + $0x28] sm:$0xff]  ;;  %v29_v20 = vld [vmem:[%s1262_s0 + $0x18] sm:$0xff]  ;;  %v30_v22 = vld [vmem:[%s1262_s0 + $0x20] sm:$0xff] }
   0x7   :  { %856 = vmatprep.mubr.msk.f32.mxu1 %vm53_vm0, %v34_v7  ;;  %v37_v21 = vld [vmem:[%s1262_s0 + $0x58] sm:$0xff]  ;;  %v38_v23 = vld [vmem:[%s1262_s0 + $0x60] sm:$0xff]  ;;  %v964_v24 = vpack.c.bf16 %v268_v19, %v267_v18  ;;  %v31_v25 = vld [vmem:[%s1262_s0 + $0x28] sm:$0xff] }
   0x8   :  { %v39_v26 = vld [vmem:[%s1262_s0 + $0x68] sm:$0xff]  ;;  %v32_v27 = vld [vmem:[%s1262_s0 + $0x30] sm:$0xff]  ;;  %v33_v29 = vld [vmem:[%s1262_s0 + $0x38] sm:$0xff] }
   0x9   :  { %955 = vmatpush3.bf16.msra.mxu0 %v952_v6  ;;  %991 = vmatpush3.bf16.msra.mxu1 %v952_v6  ;;  %v40_v28 = vld [vmem:[%s1262_s0 + $0x70] sm:$0xff]  ;;  %v41_v30 = vld [vmem:[%s1262_s0 + $0x78] sm:$0xff]  ;;  %v488_v34 = vld [vmem:[%s1264_s5] sm:$0xff] }
   0xa   :  { %957 = vmatprep.subr.bf16.mxu1 %v956_v14  ;;  %v269_v31 = vld [vmem:[%s1263_s3 + $0x30] sm:$0xff]  ;;  %v270_v32 = vld [vmem:[%s1263_s3 + $0x38] sm:$0xff]  ;;  %v489_v35 = vld [vmem:[%s1264_s5 + $0x8] sm:$0xff] }
   0xb   :  { %v968_v33 = vpack.c.bf16 %v270_v32, %v269_v31  ;;  %v490_v36 = vld [vmem:[%s1264_s5 + $0x10] sm:$0xff]  ;;  %v972_v37 = vpack.c.bf16 %v489_v35, %v488_v34  ;;  %v491_v38 = vld [vmem:[%s1264_s5 + $0x18] sm:$0xff]  ;;  %v492_v40 = vld [vmem:[%s1264_s5 + $0x20] sm:$0xff] }
   0xc   :  { %845 = vmatmul.mubr.msk.f32.vlgmr.msra.gmra.mrb[0].mxu0 %vm53_vm0, %v27_v12  ;;  %857 = vmatmul.mubr.msk.f32.vlgmr.msra.gmra.mrb[0].mxu1 %vm53_vm0, %v35_v13  ;;  %v976_v39 = vpack.c.bf16 %v491_v38, %v490_v36  ;;  %v493_v41 = vld [vmem:[%s1264_s5 + $0x28] sm:$0xff]  ;;  %v717_v43 = vld [vmem:[%s1265_s2] ss:$0 sm:$0xff] }
   0xd   :  { %847 = vmatprep.mubr.msk.f32.mxu0 %vm53_vm0, %v28_v15  ;;  %859 = vmatprep.mubr.msk.f32.mxu1 %vm53_vm0, %v36_v16  ;;  %v980_v42 = vpack.c.bf16 %v493_v41, %v492_v40  ;;  %v734_v31 = vld [vmem:[%s1266_s4] ss:$0 sm:$0xff] }
   0xe   :  { %959 = vmatpush3.bf16.msra.mxu1 %v956_v14  ;;  %973 = vmatprep.subr.bf16.mxu0 %v972_v37 }
   0xf   :  { %961 = vmatprep.subr.bf16.mxu1 %v960_v17  ;;  %975 = vmatpush3.bf16.msra.mxu0 %v972_v37 }
  0x10   :  { %848 = vmatmul.mubr.msk.f32.gmra.mrb[2].mxu0 %vm53_vm0, %v29_v20  ;;  %860 = vmatmul.mubr.msk.f32.gmra.mrb[2].mxu1 %vm53_vm0, %v37_v21 }
  0x11   :  { %850 = vmatprep.mubr.msk.f32.mxu0 %vm53_vm0, %v30_v22  ;;  %862 = vmatprep.mubr.msk.f32.mxu1 %vm53_vm0, %v38_v23 }
  0x12   :  { %963 = vmatpush3.bf16.msra.mxu1 %v960_v17  ;;  %977 = vmatprep.subr.bf16.mxu0 %v976_v39 }
  0x13   :  { %965 = vmatprep.subr.bf16.mxu1 %v964_v24  ;;  %979 = vmatpush3.bf16.msra.mxu0 %v976_v39 }
  0x14   :  { %851 = vmatmul.mubr.msk.f32.gmra.mrb[4].mxu0 %vm53_vm0, %v31_v25  ;;  %863 = vmatmul.mubr.msk.f32.gmra.mrb[4].mxu1 %vm53_vm0, %v39_v26 }
  0x15   :  { %853 = vmatprep.mubr.msk.f32.mxu0 %vm53_vm0, %v32_v27  ;;  %865 = vmatprep.mubr.msk.f32.mxu1 %vm53_vm0, %v40_v28  ;;  %v494_v28 = vld [vmem:[%s1264_s5 + $0x30] sm:$0xff] }
  0x16   :  { %967 = vmatpush3.bf16.msra.mxu1 %v964_v24  ;;  %981 = vmatprep.subr.bf16.mxu0 %v980_v42 }
  0x17   :  { %969 = vmatprep.subr.bf16.mxu1 %v968_v33  ;;  %983 = vmatpush3.bf16.msra.mxu0 %v980_v42 }
  0x18   :  { %854 = vmatmul.mubr.msk.f32.gmra.mrb[6].mxu0 %vm53_vm0, %v33_v29  ;;  %866 = vmatmul.mubr.msk.f32.gmra.mrb[6].mxu1 %vm53_vm0, %v41_v30  ;;  %v495_v29 = vld [vmem:[%s1264_s5 + $0x38] sm:$0xff] }
  0x19   :  { %v984_v30 = vpack.c.bf16 %v495_v29, %v494_v28 }
  0x1a   :  { %971 = vmatpush3.bf16.msra.mxu1 %v968_v33 }
  0x1b   :  { %985 = vmatprep.subr.bf16.mxu0 %v984_v30 }
  0x1c   :  { %987 = vmatpush3.bf16.msra.mxu0 %v984_v30 }
  0xdf   :  { %v846_v44 = vpop.f32.mrb[0].mxu0  ;;  %v858_v45 = vpop.f32.mrb[0].mxu1 }
  0xe0   :  { %v174_v46 = vadd.f32 %v846_v44, %v717_v43  ;;  %v168_v47 = vpop.f32.mrb[1].mxu0  ;;  %v208_v48 = vpop.f32.mrb[1].mxu1  ;;  %v214_v15 = vadd.f32 %v858_v45, %v717_v43 }
  0xe1   :  { %v169_v49 = vadd.f32 %v717_v43, %v168_v47  ;;  %v209_v4 = vadd.f32 %v717_v43, %v208_v48 }
  0xe2   :  { %v248_v53 = vmax.f32 %v174_v46, 0.0  ;;  %v256_v18 = vmax.f32 %v214_v15, 0.0 }
  0xe3   :  { %v247_v50 = vmax.f32 %v169_v49, 0.0  ;;  %v849_v51 = vpop.f32.mrb[2].mxu0  ;;  %v861_v52 = vpop.f32.mrb[2].mxu1  ;;  %v255_v12 = vmax.f32 %v209_v4, 0.0 }
  0xe4   :  { %v184_v54 = vadd.f32 %v849_v51, %v717_v43  ;;  %v178_v55 = vpop.f32.mrb[3].mxu0  ;;  %v218_v56 = vpop.f32.mrb[3].mxu1  ;;  %v224_v19 = vadd.f32 %v861_v52, %v717_v43 }
  0xe5   :  { %v179_v57 = vadd.f32 %v717_v43, %v178_v55  ;;  %884 = vmatprep.mubr.msk.f32.mxu1 %vm278_vm1, %v247_v50  ;;  %v219_v13 = vadd.f32 %v717_v43, %v218_v56 }
  0xe6   :  { %885 = vmatmul.mubr.msk.f32.vlgmr.msra.gmra.mrb[8].mxu1 %vm278_vm1, %v248_v53  ;;  %v250_v61 = vmax.f32 %v184_v54, 0.0  ;;  %v258_v22 = vmax.f32 %v224_v19, 0.0 }
  0xe7   :  { %v249_v58 = vmax.f32 %v179_v57, 0.0  ;;  %v852_v59 = vpop.f32.mrb[4].mxu0  ;;  %v864_v60 = vpop.f32.mrb[4].mxu1  ;;  %v257_v16 = vmax.f32 %v219_v13, 0.0 }
  0xe8   :  { %v194_v62 = vadd.f32 %v852_v59, %v717_v43  ;;  %v188_v63 = vpop.f32.mrb[5].mxu0  ;;  %v228_v0 = vpop.f32.mrb[5].mxu1  ;;  %v234_v23 = vadd.f32 %v864_v60, %v717_v43 }
  0xe9   :  { %v189_v1 = vadd.f32 %v717_v43, %v188_v63  ;;  %887 = vmatprep.mubr.msk.f32.mxu1 %vm278_vm1, %v249_v58  ;;  %v229_v17 = vadd.f32 %v717_v43, %v228_v0 }
  0xea   :  { %888 = vmatmul.mubr.msk.f32.gmra.mrb[10].mxu1 %vm278_vm1, %v250_v61  ;;  %v252_v6 = vmax.f32 %v194_v62, 0.0  ;;  %v260_v25 = vmax.f32 %v234_v23, 0.0 }
  0xeb   :  { %v251_v2 = vmax.f32 %v189_v1, 0.0  ;;  %v855_v3 = vpop.f32.mrb[6].mxu0  ;;  %v867_v5 = vpop.f32.mrb[6].mxu1  ;;  %v259_v20 = vmax.f32 %v229_v17, 0.0 }
  0xec   :  { %v204_v7 = vadd.f32 %v855_v3, %v717_v43  ;;  %v198_v8 = vpop.f32.mrb[7].mxu0  ;;  %v238_v9 = vpop.f32.mrb[7].mxu1  ;;  %v244_v26 = vadd.f32 %v867_v5, %v717_v43 }
  0xed   :  { %v199_v10 = vadd.f32 %v717_v43, %v198_v8  ;;  %890 = vmatprep.mubr.msk.f32.mxu1 %vm278_vm1, %v251_v2  ;;  %v239_v21 = vadd.f32 %v717_v43, %v238_v9 }
  0xee   :  { %891 = vmatmul.mubr.msk.f32.gmra.mrb[12].mxu1 %vm278_vm1, %v252_v6  ;;  %v254_v14 = vmax.f32 %v204_v7, 0.0  ;;  %v262_v27 = vmax.f32 %v244_v26, 0.0 }
  0xef   :  { %v253_v11 = vmax.f32 %v199_v10, 0.0  ;;  %v261_v24 = vmax.f32 %v239_v21, 0.0 }
  0xf1   :  { %893 = vmatprep.mubr.msk.f32.mxu1 %vm278_vm1, %v253_v11 }
  0xf2   :  { %894 = vmatmul.mubr.msk.f32.gmra.mrb[14].mxu1 %vm278_vm1, %v254_v14 }
  0xf3   :  { %896 = vmatprep.mubr.msk.f32.mxu1 %vm278_vm1, %v255_v12 }
  0xf6   :  { %897 = vmatmul.mubr.msk.f32.gmra.mrb[16].mxu1 %vm278_vm1, %v256_v18 }
  0xf7   :  { %899 = vmatprep.mubr.msk.f32.mxu1 %vm278_vm1, %v257_v16  ;;  %v751_v16 = vld [vmem:[%s1267_s6] ss:$0 sm:$0xff] }
  0xfa   :  { %900 = vmatmul.mubr.msk.f32.gmra.mrb[18].mxu1 %vm278_vm1, %v258_v22 }
  0xfb   :  { %902 = vmatprep.mubr.msk.f32.mxu1 %vm278_vm1, %v259_v20 }
  0xfe   :  { %903 = vmatmul.mubr.msk.f32.gmra.mrb[20].mxu1 %vm278_vm1, %v260_v25 }
  0xff   :  { %905 = vmatprep.mubr.msk.f32.mxu1 %vm278_vm1, %v261_v24 }
 0x102   :  { %906 = vmatmul.mubr.msk.f32.gmra.mrb[22].mxu1 %vm278_vm1, %v262_v27 }
 0x1b9   :  { %v886_v32 = vpop.f32.mrb[8].mxu1 }
 0x1ba   :  { %v399_v33 = vadd.f32 %v886_v32, %v734_v31  ;;  %v393_v34 = vpop.f32.mrb[9].mxu1 }
 0x1bb   :  { %v394_v35 = vadd.f32 %v734_v31, %v393_v34 }
 0x1bc   :  { %v473_v38 = vmax.f32 %v399_v33, 0.0 }
 0x1bd   :  { %v472_v36 = vmax.f32 %v394_v35, 0.0  ;;  %v889_v37 = vpop.f32.mrb[10].mxu1 }
 0x1be   :  { %v409_v39 = vadd.f32 %v889_v37, %v734_v31  ;;  %v403_v40 = vpop.f32.mrb[11].mxu1 }
 0x1bf   :  { %v404_v41 = vadd.f32 %v734_v31, %v403_v40  ;;  %924 = vmatprep.mubr.msk.f32.mxu0 %vm278_vm1, %v472_v36 }
 0x1c0   :  { %925 = vmatmul.mubr.msk.f32.vlgmr.msra.gmra.mrb[8].mxu0 %vm278_vm1, %v473_v38  ;;  %v475_v44 = vmax.f32 %v409_v39, 0.0 }
 0x1c1   :  { %v474_v42 = vmax.f32 %v404_v41, 0.0  ;;  %v892_v43 = vpop.f32.mrb[12].mxu1 }
 0x1c2   :  { %v419_v45 = vadd.f32 %v892_v43, %v734_v31  ;;  %v413_v46 = vpop.f32.mrb[13].mxu1 }
 0x1c3   :  { %v414_v47 = vadd.f32 %v734_v31, %v413_v46  ;;  %927 = vmatprep.mubr.msk.f32.mxu0 %vm278_vm1, %v474_v42 }
 0x1c4   :  { %928 = vmatmul.mubr.msk.f32.gmra.mrb[10].mxu0 %vm278_vm1, %v475_v44  ;;  %v477_v50 = vmax.f32 %v419_v45, 0.0 }
 0x1c5   :  { %v476_v48 = vmax.f32 %v414_v47, 0.0  ;;  %v895_v49 = vpop.f32.mrb[14].mxu1 }
 0x1c6   :  { %v429_v51 = vadd.f32 %v895_v49, %v734_v31  ;;  %v423_v52 = vpop.f32.mrb[15].mxu1 }
 0x1c7   :  { %v424_v53 = vadd.f32 %v734_v31, %v423_v52  ;;  %930 = vmatprep.mubr.msk.f32.mxu0 %vm278_vm1, %v476_v48 }
 0x1c8   :  { %931 = vmatmul.mubr.msk.f32.gmra.mrb[12].mxu0 %vm278_vm1, %v477_v50  ;;  %v479_v56 = vmax.f32 %v429_v51, 0.0 }
 0x1c9   :  { %v478_v54 = vmax.f32 %v424_v53, 0.0  ;;  %v898_v55 = vpop.f32.mrb[16].mxu1 }
 0x1ca   :  { %v439_v57 = vadd.f32 %v898_v55, %v734_v31  ;;  %v433_v58 = vpop.f32.mrb[17].mxu1 }
 0x1cb   :  { %v434_v59 = vadd.f32 %v734_v31, %v433_v58  ;;  %933 = vmatprep.mubr.msk.f32.mxu0 %vm278_vm1, %v478_v54 }
 0x1cc   :  { %934 = vmatmul.mubr.msk.f32.gmra.mrb[14].mxu0 %vm278_vm1, %v479_v56  ;;  %v481_v62 = vmax.f32 %v439_v57, 0.0 }
 0x1cd   :  { %v480_v60 = vmax.f32 %v434_v59, 0.0  ;;  %v901_v61 = vpop.f32.mrb[18].mxu1 }
 0x1ce   :  { %v449_v63 = vadd.f32 %v901_v61, %v734_v31  ;;  %v443_v0 = vpop.f32.mrb[19].mxu1 }
 0x1cf   :  { %v444_v1 = vadd.f32 %v734_v31, %v443_v0  ;;  %936 = vmatprep.mubr.msk.f32.mxu0 %vm278_vm1, %v480_v60 }
 0x1d0   :  { %937 = vmatmul.mubr.msk.f32.gmra.mrb[16].mxu0 %vm278_vm1, %v481_v62  ;;  %v483_v4 = vmax.f32 %v449_v63, 0.0 }
 0x1d1   :  { %v482_v2 = vmax.f32 %v444_v1, 0.0  ;;  %v904_v3 = vpop.f32.mrb[20].mxu1 }
 0x1d2   :  { %v459_v5 = vadd.f32 %v904_v3, %v734_v31  ;;  %v453_v6 = vpop.f32.mrb[21].mxu1 }
 0x1d3   :  { %v454_v7 = vadd.f32 %v734_v31, %v453_v6  ;;  %939 = vmatprep.mubr.msk.f32.mxu0 %vm278_vm1, %v482_v2 }
 0x1d4   :  { %940 = vmatmul.mubr.msk.f32.gmra.mrb[18].mxu0 %vm278_vm1, %v483_v4  ;;  %v485_v10 = vmax.f32 %v459_v5, 0.0 }
 0x1d5   :  { %v484_v8 = vmax.f32 %v454_v7, 0.0  ;;  %v907_v9 = vpop.f32.mrb[22].mxu1 }
 0x1d6   :  { %v469_v11 = vadd.f32 %v907_v9, %v734_v31  ;;  %v463_v12 = vpop.f32.mrb[23].mxu1 }
 0x1d7   :  { %v464_v13 = vadd.f32 %v734_v31, %v463_v12  ;;  %942 = vmatprep.mubr.msk.f32.mxu0 %vm278_vm1, %v484_v8 }
 0x1d8   :  { %943 = vmatmul.mubr.msk.f32.gmra.mrb[20].mxu0 %vm278_vm1, %v485_v10  ;;  %v487_v15 = vmax.f32 %v469_v11, 0.0 }
 0x1d9   :  { %v486_v14 = vmax.f32 %v464_v13, 0.0 }
 0x1db   :  { %945 = vmatprep.mubr.msk.f32.mxu0 %vm278_vm1, %v486_v14 }
 0x1dc   :  { %946 = vmatmul.mubr.msk.f32.gmra.mrb[22].mxu0 %vm278_vm1, %v487_v15 }
 0x293   :  { %v926_v17 = vpop.f32.mrb[8].mxu0 }
 0x294   :  { %v623_v18 = vadd.f32 %v926_v17, %v751_v16  ;;  %v617_v19 = vpop.f32.mrb[9].mxu0 }
 0x295   :  { %v618_v20 = vadd.f32 %v751_v16, %v617_v19 }
 0x296   :  { %698 = vst.msk [vmem:[%s1268_s7 + $0x8] sm:$0xff] %vm696_vm2, %v623_v18 }
 0x297   :  { %697 = vst.msk [vmem:[%s1268_s7] sm:$0xff] %vm696_vm2, %v618_v20  ;;  %v929_v21 = vpop.f32.mrb[10].mxu0 }
 0x298   :  { %v633_v22 = vadd.f32 %v929_v21, %v751_v16  ;;  %v627_v23 = vpop.f32.mrb[11].mxu0 }
 0x299   :  { %v628_v24 = vadd.f32 %v751_v16, %v627_v23 }
 0x29a   :  { %700 = vst.msk [vmem:[%s1268_s7 + $0x18] sm:$0xff] %vm696_vm2, %v633_v22 }
 0x29b   :  { %699 = vst.msk [vmem:[%s1268_s7 + $0x10] sm:$0xff] %vm696_vm2, %v628_v24  ;;  %v932_v25 = vpop.f32.mrb[12].mxu0 }
 0x29c   :  { %v643_v26 = vadd.f32 %v932_v25, %v751_v16  ;;  %v637_v27 = vpop.f32.mrb[13].mxu0 }
 0x29d   :  { %v638_v28 = vadd.f32 %v751_v16, %v637_v27 }
 0x29e   :  { %702 = vst.msk [vmem:[%s1268_s7 + $0x28] sm:$0xff] %vm696_vm2, %v643_v26 }
 0x29f   :  { %701 = vst.msk [vmem:[%s1268_s7 + $0x20] sm:$0xff] %vm696_vm2, %v638_v28  ;;  %v935_v29 = vpop.f32.mrb[14].mxu0 }
 0x2a0   :  { %v653_v30 = vadd.f32 %v935_v29, %v751_v16  ;;  %v647_v31 = vpop.f32.mrb[15].mxu0 }
 0x2a1   :  { %v648_v32 = vadd.f32 %v751_v16, %v647_v31 }
 0x2a2   :  { %704 = vst.msk [vmem:[%s1268_s7 + $0x38] sm:$0xff] %vm696_vm2, %v653_v30 }
 0x2a3   :  { %703 = vst.msk [vmem:[%s1268_s7 + $0x30] sm:$0xff] %vm696_vm2, %v648_v32  ;;  %v938_v33 = vpop.f32.mrb[16].mxu0 }
 0x2a4   :  { %v663_v34 = vadd.f32 %v938_v33, %v751_v16  ;;  %v657_v35 = vpop.f32.mrb[17].mxu0 }
 0x2a5   :  { %v658_v36 = vadd.f32 %v751_v16, %v657_v35 }
 0x2a6   :  { %706 = vst.msk [vmem:[%s1268_s7 + $0x48] sm:$0xff] %vm696_vm2, %v663_v34 }
 0x2a7   :  { %705 = vst.msk [vmem:[%s1268_s7 + $0x40] sm:$0xff] %vm696_vm2, %v658_v36  ;;  %v941_v37 = vpop.f32.mrb[18].mxu0 }
 0x2a8   :  { %v673_v38 = vadd.f32 %v941_v37, %v751_v16  ;;  %v667_v39 = vpop.f32.mrb[19].mxu0 }
 0x2a9   :  { %v668_v40 = vadd.f32 %v751_v16, %v667_v39 }
 0x2aa   :  { %708 = vst.msk [vmem:[%s1268_s7 + $0x58] sm:$0xff] %vm696_vm2, %v673_v38 }
 0x2ab   :  { %707 = vst.msk [vmem:[%s1268_s7 + $0x50] sm:$0xff] %vm696_vm2, %v668_v40  ;;  %v944_v41 = vpop.f32.mrb[20].mxu0 }
 0x2ac   :  { %v683_v42 = vadd.f32 %v944_v41, %v751_v16  ;;  %v677_v43 = vpop.f32.mrb[21].mxu0 }
 0x2ad   :  { %v678_v44 = vadd.f32 %v751_v16, %v677_v43 }
 0x2ae   :  { %710 = vst.msk [vmem:[%s1268_s7 + $0x68] sm:$0xff] %vm696_vm2, %v683_v42 }
 0x2af   :  { %709 = vst.msk [vmem:[%s1268_s7 + $0x60] sm:$0xff] %vm696_vm2, %v678_v44  ;;  %v947_v45 = vpop.f32.mrb[22].mxu0 }
 0x2b0   :  { %v693_v46 = vadd.f32 %v947_v45, %v751_v16  ;;  %v687_v47 = vpop.f32.mrb[23].mxu0 }
 0x2b1   :  { %v688_v48 = vadd.f32 %v751_v16, %v687_v47 }
 0x2b2   :  { %712 = vst.msk [vmem:[%s1268_s7 + $0x78] sm:$0xff] %vm696_vm2, %v693_v46 }
 0x2b3   :  { %711 = vst.msk [vmem:[%s1268_s7 + $0x70] sm:$0xff] %vm696_vm2, %v688_v48 }

</bundles_post_ra>
